<compile_context>
chip_gen: v7x
topology: tpu7x:2x2x1
jax: 0.10.0
libtpu: 0.0.40
codegen_flags: <defaults>
</compile_context>

<pallas_src>
import functools

import jax
import jax.numpy as jnp
from jax.experimental import pallas as pl
from jax.experimental.pallas import tpu as pltpu


def _round_up(x, m):
    return ((x + m - 1) // m) * m


def _vmem_capacity_bytes():
    try:
        return int(pltpu.get_tpu_info().vmem_capacity_bytes)
    except Exception:
        return 64 * 1024 * 1024  # conservative (v7x-sized) fallback


_VMEM_CAP = _vmem_capacity_bytes()


# --------------------------------------------------------------------------
# Kernels
# --------------------------------------------------------------------------
def _bigram_ce_kernel(it_ref, table_ref, logits_ref, loss_ref, *, n_valid):
    # it_ref     : (TN, 2) int32, col 0 = token id, col 1 = target id
    # table_ref  : (Vp, Vp) f32, whole table resident in VMEM (single buffer)
    # logits_ref : (TN, Vp) f32 output tile (lane-dense)
    # loss_ref   : (TN, 1)  f32 per-row CE output tile (padded rows -> 0)
    step = pl.program_id(0)
    tn = it_ref.shape[0]
    vp = table_ref.shape[1]

    it = it_ref[...]                                             # (TN, 2)
    idx = it[:, 0:1]                                             # (TN, 1)
    tgt = it[:, 1:2]                                             # (TN, 1)
    lane = jax.lax.broadcasted_iota(jnp.int32, (tn, vp), 1)      # (TN, Vp)

    # Embedding lookup: exact one-hot row select on the MXU.
    # TODO(synk): for large vocab on v5e this matmul becomes MXU-bound; a
    # direct row gather from the resident table would be preferable there.
    onehot = (lane == idx).astype(jnp.float32)                   # (TN, Vp)
    logits = jnp.dot(onehot, table_ref[...],
                     preferred_element_type=jnp.float32,
                     precision=jax.lax.Precision.HIGHEST)        # (TN, Vp)
    logits_ref[...] = logits

    # Cross entropy: logsumexp(logits) - logits[target], masked for row pad.
    m = jnp.max(logits, axis=-1, keepdims=True)                  # (TN, 1)
    lse = jnp.log(jnp.sum(jnp.exp(logits - m), axis=-1,
                          keepdims=True)) + m                    # (TN, 1)
    picked = jnp.sum(jnp.where(lane == tgt, logits, 0.0),
                     axis=-1, keepdims=True)                     # (TN, 1)
    per_row = lse - picked                                       # (TN, 1)

    row = step * tn + jax.lax.broadcasted_iota(jnp.int32, (tn, 1), 0)
    loss_ref[...] = jnp.where(row < n_valid, per_row, 0.0)


def _bigram_logits_kernel(idx_ref, table_ref, logits_ref):
    # Logits-only path (targets is None): no CE work at all.
    tn = idx_ref.shape[0]
    vp = table_ref.shape[1]
    lane = jax.lax.broadcasted_iota(jnp.int32, (tn, vp), 1)
    onehot = (lane == idx_ref[...]).astype(jnp.float32)
    logits_ref[...] = jnp.dot(onehot, table_ref[...],
                              preferred_element_type=jnp.float32,
                              precision=jax.lax.Precision.HIGHEST)


# --------------------------------------------------------------------------
# Wrappers
# --------------------------------------------------------------------------
def pad_vocab_table(table):
    """Pad the (V, V) embedding table to lane-aligned (Vp, Vp).

    Padded entries are -1e30 so padded vocab columns vanish in the logsumexp.
    Call once at model init (hoisted out of the per-forward path).
    """
    V = table.shape[0]
    Vp = _round_up(V, 128)
    if Vp == V:
        return table.astype(jnp.float32)
    table_p = jnp.full((Vp, Vp), jnp.float32(-1e30))
    return table_p.at[:V, :V].set(table.astype(jnp.float32))


def _choose_block_rows(n, vp, vmem_cap):
    # Per-row VMEM cost: double-buffered logits tile (2*Vp*4) + ~3 tiles worth
    # of f32 temporaries (onehot / logits / exp) + lane-padded idx & loss tiles.
    per_row = (2 + 3) * vp * 4 + 4 * 128 * 4
    budget = int(0.75 * vmem_cap) - vp * vp * 4   # leave room for the table
    tn = budget // per_row if budget > 0 else 8
    tn = min(tn, 8192)                            # diminishing returns past a few MiB/tile
    tn = min(tn, _round_up(n, 8))                 # never pad past one tile of rows
    tn = max(8, (tn // 8) * 8)
    return int(tn)


@functools.partial(jax.jit, static_argnames=("vocab_size", "block_rows"))
def bigram_forward_padded(idx, targets, table_p, *, vocab_size, block_rows=None):
    B, T = idx.shape
    V = vocab_size
    Vp = table_p.shape[0]
    N = B * T

    TN = block_rows if block_rows is not None else _choose_block_rows(N, Vp, _VMEM_CAP)
    TN = max(8, _round_up(TN, 8))
    N_pad = _round_up(N, TN)
    grid = (N_pad // TN,)

    # VMEM budget: resident table (single buffer) + double-buffered logits /
    # index / per-row-loss tiles + in-kernel temporaries headroom.  The limit
    # is generation-aware and never falls below the actual need.
    vmem_need = (Vp * Vp * 4
                 + 2 * TN * Vp * 4
                 + 2 * TN * 128 * 4
                 + 2 * TN * 128 * 4
                 + 3 * TN * Vp * 4)
    vmem_limit = min(max(int(1.25 * vmem_need), 8 * 1024 * 1024),
                     int(0.9 * _VMEM_CAP))
    vmem_limit = int(min(max(vmem_limit, vmem_need), _VMEM_CAP))
    # TODO(synk): for very large vocab (Vp*Vp*4 approaching VMEM) the resident
    # table must be column-tiled with an online logsumexp instead.

    # Whole table in VMEM, untiled -> single allocation, no double buffering.
    table_spec = pl.BlockSpec(memory_space=pltpu.MemorySpace.VMEM)

    if targets is None:
        idx_flat = jnp.zeros((N_pad, 1), jnp.int32).at[:N, 0].set(
            idx.reshape(N).astype(jnp.int32))
        logits_pad = pl.pallas_call(
            _bigram_logits_kernel,
            grid=grid,
            in_specs=[pl.BlockSpec((TN, 1), lambda i: (i, 0)), table_spec],
            out_specs=pl.BlockSpec((TN, Vp), lambda i: (i, 0)),
            out_shape=jax.ShapeDtypeStruct((N_pad, Vp), jnp.float32),
            compiler_params=pltpu.CompilerParams(
                dimension_semantics=("parallel",),
                vmem_limit_bytes=vmem_limit),
            cost_estimate=pl.CostEstimate(
                flops=2 * N_pad * Vp * Vp,
                transcendentals=0,
                bytes_accessed=N_pad * Vp * 4 + Vp * Vp * 4 + N_pad * 4),
        )(idx_flat, table_p)
        # NOTE: when V % 128 == 0 and N_pad == N this slice/reshape is a view.
        return logits_pad[:N, :V].reshape(B, T, V), None

    # idx and targets merged into one (N_pad, 2) tile stream (one DMA/step).
    it = jnp.zeros((N_pad, 2), jnp.int32)
    it = it.at[:N, 0].set(idx.reshape(N).astype(jnp.int32))
    it = it.at[:N, 1].set(targets.reshape(N).astype(jnp.int32))

    kernel = functools.partial(_bigram_ce_kernel, n_valid=N)
    logits_pad, per_row_loss = pl.pallas_call(
        kernel,
        grid=grid,
        in_specs=[pl.BlockSpec((TN, 2), lambda i: (i, 0)), table_spec],
        out_specs=(pl.BlockSpec((TN, Vp), lambda i: (i, 0)),
                   pl.BlockSpec((TN, 1), lambda i: (i, 0))),
        out_shape=(jax.ShapeDtypeStruct((N_pad, Vp), jnp.float32),
                   jax.ShapeDtypeStruct((N_pad, 1), jnp.float32)),
        compiler_params=pltpu.CompilerParams(
            dimension_semantics=("parallel",),   # no carried state -> megacore OK
            vmem_limit_bytes=vmem_limit),
        cost_estimate=pl.CostEstimate(
            flops=2 * N_pad * Vp * Vp,
            transcendentals=N_pad * Vp,
            bytes_accessed=N_pad * Vp * 4 + Vp * Vp * 4 + N_pad * 2 * 4 + N_pad * 4),
    )(it, table_p)

    # Padded rows were zeroed in-kernel, so a full tree-sum is exact and the
    # reduction order is stable (no serial carried accumulator).
    loss = jnp.sum(per_row_loss) / jnp.float32(N)
    # NOTE: when V % 128 == 0 and N_pad == N this slice/reshape is a view.
    logits = logits_pad[:N, :V].reshape(B, T, V)
    return logits, loss


def bigram_forward(idx, targets, table, *, block_rows=None):
    """Convenience wrapper taking the raw (V, V) table (pads per call).

    Prefer pad_vocab_table(...) once at init + bigram_forward_padded(...).
    """
    return bigram_forward_padded(idx, targets, pad_vocab_table(table),
                                 vocab_size=table.shape[0],
                                 block_rows=block_rows)


if __name__ == "__main__":
    key = jax.random.PRNGKey(0)
    k_table, k_idx, k_tgt = jax.random.split(key, 3)

    # Config 1: char-level-ish vocab (not a multiple of 128) to exercise lane
    # padding, forced tiny block_rows to exercise the multi-tile grid + row
    # masking + per-tile partial-loss reduction.
    vocab_size = 65
    B, T = 2, 7        # N = 14 -> padded to 16 rows -> grid of 2 with block_rows=8
    table = jax.random.normal(k_table, (vocab_size, vocab_size), jnp.float32)
    idx = jax.random.randint(k_idx, (B, T), 0, vocab_size, jnp.int32)
    targets = jax.random.randint(k_tgt, (B, T), 0, vocab_size, jnp.int32)

    table_p = pad_vocab_table(table)    # hoisted: pad once at "model init"
    logits, loss = bigram_forward_padded(idx, targets, table_p,
                                         vocab_size=vocab_size, block_rows=8)
    jax.block_until_ready((logits, loss))

    ref_logits = table[idx]                                       # (B, T, V)
    flat = ref_logits.reshape(B * T, vocab_size)
    lse = jax.scipy.special.logsumexp(flat, axis=-1)
    picked = jnp.take_along_axis(flat, targets.reshape(-1, 1), axis=-1)[:, 0]
    ref_loss = jnp.mean(lse - picked)
    assert jnp.allclose(logits, ref_logits, atol=1e-5, rtol=1e-5), "logits mismatch"
    assert jnp.allclose(loss, ref_loss, atol=1e-4, rtol=1e-4), "loss mismatch"

    # Also exercise the specialized targets=None (logits-only) path.
    logits_only, no_loss = bigram_forward_padded(idx, None, table_p,
                                                 vocab_size=vocab_size,
                                                 block_rows=8)
    jax.block_until_ready(logits_only)
    assert no_loss is None
    assert jnp.allclose(logits_only, ref_logits, atol=1e-5, rtol=1e-5), \
        "logits mismatch (targets=None)"

    # Config 2: lane-exact vocab, auto block_rows (single grid step, repack-free).
    vocab2, B2, T2 = 128, 2, 8
    table2 = jax.random.normal(k_table, (vocab2, vocab2), jnp.float32)
    idx2 = jax.random.randint(k_idx, (B2, T2), 0, vocab2, jnp.int32)
    targets2 = jax.random.randint(k_tgt, (B2, T2), 0, vocab2, jnp.int32)
    logits2, loss2 = bigram_forward(idx2, targets2, table2)
    jax.block_until_ready((logits2, loss2))

    ref_logits2 = table2[idx2]
    flat2 = ref_logits2.reshape(B2 * T2, vocab2)
    lse2 = jax.scipy.special.logsumexp(flat2, axis=-1)
    picked2 = jnp.take_along_axis(flat2, targets2.reshape(-1, 1), axis=-1)[:, 0]
    ref_loss2 = jnp.mean(lse2 - picked2)
    assert jnp.allclose(logits2, ref_logits2, atol=1e-5, rtol=1e-5), "logits mismatch (cfg2)"
    assert jnp.allclose(loss2, ref_loss2, atol=1e-4, rtol=1e-4), "loss mismatch (cfg2)"

    # TODO(synk): generate() (autoregressive torch.multinomial sampling loop) is
    # host-side control flow and is not implemented as a Pallas kernel.
    print("KERNEL_OK")
</pallas_src>

<mosaic_0001>
module attributes {stable_mosaic.version = 11 : i64} {
  func.func @_bigram_ce_kernel(%arg0: i32, %arg1: memref<8x2xi32, #tpu.memory_space<vmem>>, %arg2: memref<128x128xf32, #tpu.memory_space<vmem>>, %arg3: memref<8x128xf32, #tpu.memory_space<vmem>>, %arg4: memref<8x1xf32, #tpu.memory_space<vmem>>) attributes {dimension_semantics = [#tpu.dimension_semantics<parallel>], iteration_bounds = array<i64: 2>, scalar_prefetch = 0 : i64, scratch_operands = 0 : i64, tpu.core_type = #tpu.core_type<tc>, window_params = [{transform_indices = @transform_0, window_bounds = array<i64: 8, 2>}, {pipeline_mode = #tpu.pipeline_mode<synchronous>, transform_indices = @transform_1, window_bounds = array<i64: 128, 128>}, {transform_indices = @transform_2, window_bounds = array<i64: 8, 128>}, {transform_indices = @transform_3, window_bounds = array<i64: 8, 1>}]} {
    %c0 = arith.constant 0 : index
    %c0_0 = arith.constant 0 : index
    %0 = vector.load %arg1[%c0, %c0_0] : memref<8x2xi32, #tpu.memory_space<vmem>>, vector<8x2xi32>
    %1 = vector.extract_strided_slice %0 {offsets = [0, 0], sizes = [8, 1], strides = [1, 1]} : vector<8x2xi32> to vector<8x1xi32>
    %2 = vector.extract_strided_slice %0 {offsets = [0, 1], sizes = [8, 1], strides = [1, 1]} : vector<8x2xi32> to vector<8x1xi32>
    %3 = tpu.iota {dimensions = array<i32: 1>} : vector<8x128xi32>
    %4 = vector.broadcast %1 : vector<8x1xi32> to vector<8x128xi32>
    %5 = arith.cmpi eq, %3, %4 : vector<8x128xi32>
    %6 = arith.extui %5 : vector<8x128xi1> to vector<8x128xi32>
    %7 = arith.sitofp %6 : vector<8x128xi32> to vector<8x128xf32>
    %c0_1 = arith.constant 0 : index
    %c0_2 = arith.constant 0 : index
    %8 = vector.load %arg2[%c0_1, %c0_2] : memref<128x128xf32, #tpu.memory_space<vmem>>, vector<128x128xf32>
    %cst = arith.constant dense<0.000000e+00> : vector<8x128xf32>
    %9 = tpu.matmul %7, %8, %cst {dimension_numbers = #tpu.dot_dimension_numbers<[1], [0], [0], [1], [0, 0, 1, 1], [], []>, precision = #tpu.contract_precision<fp32>} : vector<8x128xf32>, vector<128x128xf32>, vector<8x128xf32> -> vector<8x128xf32>
    %c0_3 = arith.constant 0 : index
    %c0_4 = arith.constant 0 : index
    %10 = vector.load %arg3[%c0_3, %c0_4] : memref<8x128xf32, #tpu.memory_space<vmem>>, vector<8x128xf32>
    tpu.vector_store %arg3[%c0_3, %c0_4], %9 {strides = array<i32>} : memref<8x128xf32, #tpu.memory_space<vmem>>, vector<8x128xf32>,
    %cst_5 = arith.constant dense<0xFF800000> : vector<8xf32>
    %11 = vector.multi_reduction <maximumf>, %9, %cst_5 [1] : vector<8x128xf32> to vector<8xf32>
    %12 = vector.shape_cast %11 : vector<8xf32> to vector<8x1xf32>
    %13 = vector.broadcast %12 : vector<8x1xf32> to vector<8x128xf32>
    %14 = arith.subf %9, %13 : vector<8x128xf32>
    %15 = math.exp %14 : vector<8x128xf32>
    %cst_6 = arith.constant dense<0.000000e+00> : vector<8xf32>
    %16 = vector.multi_reduction <add>, %15, %cst_6 [1] : vector<8x128xf32> to vector<8xf32>
    %17 = vector.shape_cast %16 : vector<8xf32> to vector<8x1xf32>
    %18 = math.log %17 : vector<8x1xf32>
    %19 = arith.addf %18, %12 : vector<8x1xf32>
    %20 = vector.broadcast %2 : vector<8x1xi32> to vector<8x128xi32>
    %21 = arith.cmpi eq, %3, %20 : vector<8x128xi32>
    %cst_7 = arith.constant 0.000000e+00 : f32
    %22 = vector.broadcast %cst_7 : f32 to vector<8x128xf32>
    %23 = arith.select %21, %9, %22 : vector<8x128xi1>, vector<8x128xf32>
    %cst_8 = arith.constant dense<0.000000e+00> : vector<8xf32>
    %24 = vector.multi_reduction <add>, %23, %cst_8 [1] : vector<8x128xf32> to vector<8xf32>
    %25 = vector.shape_cast %24 : vector<8xf32> to vector<8x1xf32>
    %26 = arith.subf %19, %25 : vector<8x1xf32>
    %c8_i32 = arith.constant 8 : i32
    %27 = arith.muli %arg0, %c8_i32 : i32
    %28 = tpu.iota {dimensions = array<i32: 0>} : vector<8x1xi32>
    %29 = vector.broadcast %27 : i32 to vector<8x1xi32>
    %30 = arith.addi %29, %28 : vector<8x1xi32>
    %c14_i32 = arith.constant 14 : i32
    %31 = vector.broadcast %c14_i32 : i32 to vector<8x1xi32>
    %32 = arith.cmpi slt, %30, %31 : vector<8x1xi32>
    %cst_9 = arith.constant 0.000000e+00 : f32
    %33 = vector.broadcast %cst_9 : f32 to vector<8x1xf32>
    %34 = arith.select %32, %26, %33 : vector<8x1xi1>, vector<8x1xf32>
    %c0_10 = arith.constant 0 : index
    %c0_11 = arith.constant 0 : index
    %35 = vector.load %arg4[%c0_10, %c0_11] : memref<8x1xf32, #tpu.memory_space<vmem>>, vector<8x1xf32>
    tpu.vector_store %arg4[%c0_10, %c0_11], %34 {strides = array<i32>} : memref<8x1xf32, #tpu.memory_space<vmem>>, vector<8x1xf32>,
    return
  }
  func.func @transform_0(%arg0: i32) -> (i32, i32) {
    %c0_i32 = arith.constant 0 : i32
    %c0_i32_0 = arith.constant 0 : i32
    return %arg0, %c0_i32 : i32, i32
  }
  func.func @transform_1(%arg0: i32) -> (i32, i32) {
    %c0_i32 = arith.constant 0 : i32
    %c0_i32_0 = arith.constant 0 : i32
    %c0_i32_1 = arith.constant 0 : i32
    return %c0_i32, %c0_i32_0 : i32, i32
  }
  func.func @transform_2(%arg0: i32) -> (i32, i32) {
    %c0_i32 = arith.constant 0 : i32
    %c0_i32_0 = arith.constant 0 : i32
    return %arg0, %c0_i32 : i32, i32
  }
  func.func @transform_3(%arg0: i32) -> (i32, i32) {
    %c0_i32 = arith.constant 0 : i32
    %c0_i32_0 = arith.constant 0 : i32
    return %arg0, %c0_i32 : i32, i32
  }
}

</mosaic_0001>

<bundles_post_ra>
// kernel: bigram_forward_padded.1
= control target key start
LH: loop header
LB: loop body
LE: loop exit
PB: predicated region body
PF: predicated region fallthrough
CT: control target
= control target key end

     0   :  { %s1490_s12 = smov 0   ;;  %s1874_s0 = inlined_call_operand.vmem [shape: s32[16,2], index: 0, kind: input, shape index: {}]   ;;  %s1875_s1 = inlined_call_operand.vmem [shape: f32[128,128], index: 1, kind: input, shape index: {}]   ;;  %s1876_s2 = inlined_call_operand.vmem [shape: f32[16,128], index: 2, kind: output, shape index: {0}]   ;;  %s1877_s3 = inlined_call_operand.vmem [shape: f32[16,1], index: 3, kind: output, shape index: {1}]  }
   0x1 LB: > { %s1496_s13 = sadd.s32 4294967295, %s1462_s12   ;;  %p959_p0 = scmp.ge.s32.totalorder %s1462_s12, 1  ;;  %s1462_s12 = sphi %s1490_s12, %s14_s12  }
   0x2   : > { %p139_p1 = scmp.lt.s32.totalorder %s1462_s12, 3 }
   0x4   : > { %p140_p2 = pnand %p959_p0, %p139_p1 }
   0x5   : > { %p165_p3 = scmp.lt.s32.totalorder (!%p140_p2), %s1496_s13, 1  ;;  %v186_v0 = vld [vmem:[%s1875_s1] sm:$0xff] (!%p140_p2)  ;;  %v187_v1 = vld [vmem:[%s1875_s1 + $0x8] sm:$0xff] (!%p140_p2)  ;;  %v188_v2 = vld [vmem:[%s1875_s1 + $0x10] sm:$0xff] (!%p140_p2)  ;;  %v1464_v3 = vmov (!%p140_p2), 0   ;;  %v1465_v4 = vmov (!%p140_p2), 0.0|0.0  }
   0x6   : > { %143 = sbr.rel (%p140_p2) target bundleno = 752 (0x2f0), region = 28  ;;  %1449 = vset.pattern.permute.xlu0 (!%p140_p2), %v1464_v3  ;;  %1354 = vmatprep.subr.bf16.mxu0 (!%p140_p2), %v1465_v4  ;;  %v203_v5 = vand.u32 (!%p140_p2), 4294901760, %v186_v0  ;;  %v206_v6 = vand.u32 (!%p140_p2), 4294901760, %v187_v1  ;;  %v189_v7 = vld [vmem:[%s1875_s1 + $0x18] sm:$0xff] (!%p140_p2)  ;;  %v209_v8 = vand.u32 (!%p140_p2), 4294901760, %v188_v2  ;;  %v190_v9 = vld [vmem:[%s1875_s1 + $0x20] sm:$0xff] (!%p140_p2) }
   0x7   : > { %v191_v10 = vld [vmem:[%s1875_s1 + $0x28] sm:$0xff] (!%p140_p2)  ;;  %1282 = vmatprep.subr.bf16.mxu1 (!%p140_p2), %v1465_v4  ;;  %v212_v11 = vand.u32 (!%p140_p2), 4294901760, %v189_v7  ;;  %v215_v12 = vand.u32 (!%p140_p2), 4294901760, %v190_v9  ;;  %v192_v14 = vld [vmem:[%s1875_s1 + $0x30] sm:$0xff] (!%p140_p2)  ;;  %v193_v15 = vld [vmem:[%s1875_s1 + $0x38] sm:$0xff] (!%p140_p2)  ;;  %vm1466_vm0 = vmmov (!%p140_p2), 0  }
   0x8   : > { %v218_v13 = vand.u32 (!%p140_p2), 4294901760, %v191_v10  ;;  %v1530_v16 = vpack.c.bf16 (!%p140_p2), %v206_v6, %v203_v5  ;;  %v1532_v17 = vsub.f32 (!%p140_p2), %v186_v0, %v203_v5  ;;  %v1534_v18 = vsub.f32 (!%p140_p2), %v187_v1, %v206_v6  ;;  %v194_v20 = vld [vmem:[%s1875_s1 + $0x40] sm:$0xff] (!%p140_p2)  ;;  %v195_v21 = vld [vmem:[%s1875_s1 + $0x48] sm:$0xff] (!%p140_p2)  ;;  %v1547_v22 = vld [vmem:[%s1875_s1 + $0x50] sm:$0xff] (!%p140_p2)  ;;  %s967_s29 = sshll.u32 (!%p140_p2), %s1496_s13, 3 }
   0x9   : > { %v1536_v19 = vsub.f32 (!%p140_p2), %v188_v2, %v209_v8  ;;  %v1551_v23 = vpack.c.bf16 (!%p140_p2), %v212_v11, %v209_v8  ;;  %v1553_v24 = vsub.f32 (!%p140_p2), %v189_v7, %v212_v11  ;;  %v1555_v25 = vsub.f32 (!%p140_p2), %v190_v9, %v215_v12  ;;  %v1560_v26 = vld [vmem:[%s1875_s1 + $0x58] sm:$0xff] (!%p140_p2)  ;;  %v1565_v27 = vld [vmem:[%s1875_s1 + $0x60] sm:$0xff] (!%p140_p2)  ;;  %v1584_v36 = vld [vmem:[%s1875_s1 + $0x68] sm:$0xff] (!%p140_p2) }
   0xa   : > { %1356 = vmatpush3.bf16.msra.mxu0 (!%p140_p2), %v1530_v16  ;;  %1284 = vmatpush3.bf16.msra.mxu1 (!%p140_p2), %v1530_v16  ;;  %v1573_v28 = vsub.f32 (!%p140_p2), %v191_v10, %v218_v13  ;;  %v221_v29 = vand.u32 (!%p140_p2), 4294901760, %v192_v14  ;;  %v224_v30 = vand.u32 (!%p140_p2), 4294901760, %v193_v15  ;;  %v227_v31 = vand.u32 (!%p140_p2), 4294901760, %v194_v20  ;;  %v1597_v41 = vld [vmem:[%s1875_s1 + $0x70] sm:$0xff] (!%p140_p2)  ;;  %v1607_v44 = vld [vmem:[%s1875_s1 + $0x78] sm:$0xff] (!%p140_p2) }
   0xb   : > { %1357 = vmatprep.subr.bf16.mxu0 (!%p140_p2), %v1465_v4  ;;  %1285 = vmatprep.subr.bf16.mxu1 (!%p140_p2), %v1465_v4  ;;  %v230_v33 = vand.u32 (!%p140_p2), 4294901760, %v195_v21  ;;  %v233_v34 = vand.u32 (!%p140_p2), 4294901760, %v1547_v22  ;;  %v236_v35 = vand.u32 (!%p140_p2), 4294901760, %v1560_v26  ;;  %v239_v40 = vand.u32 (!%p140_p2), 4294901760, %v1565_v27 }
   0xc   : > { %v1587_v37 = vsub.f32 (!%p140_p2), %v192_v14, %v221_v29  ;;  %v1589_v38 = vsub.f32 (!%p140_p2), %v193_v15, %v224_v30  ;;  %v1591_v39 = vsub.f32 (!%p140_p2), %v194_v20, %v227_v31  ;;  %v1611_v45 = vpack.c.bf16 (!%p140_p2), %v218_v13, %v215_v12 }
   0xd   : > { %s166_s26 = scalar_select %p165_p3, %s1496_s13, 1  ;;  %v1599_v42 = vsub.f32 %v195_v21, %v230_v33  ;;  %v1602_v43 = vsub.f32 %v1547_v22, %v233_v34  ;;  %v1614_v46 = vsub.f32 %v1560_v26, %v236_v35  ;;  %v242_v47 = vand.u32 4294901760, %v1584_v36 }
   0xe   : > { %1359 = vmatpush3.bf16.msra.mxu0 %v1551_v23  ;;  %1287 = vmatpush3.bf16.msra.mxu1 %v1551_v23  ;;  %v1620_v48 = vsub.f32 %v1565_v27, %v239_v40  ;;  %v245_v49 = vand.u32 4294901760, %v1597_v41  ;;  %v248_v51 = vand.u32 4294901760, %v1607_v44  ;;  %v1467_v53 = vmov 0.0  }
   0xf   : > { %s1549_s10 = sshll.u32 %s166_s26, 3  ;;  %1360 = vmatprep.subr.bf16.mxu0 %v1465_v4  ;;  %1288 = vmatprep.subr.bf16.mxu1 %v1465_v4  ;;  %v1626_v50 = vsub.f32 %v1584_v36, %v242_v47  ;;  %v296_v54 = vand.u32 4294901760, %v1532_v17  ;;  %v303_v55 = vand.u32 4294901760, %v1534_v18  ;;  %v1642_v56 = vpack.c.bf16 %v224_v30, %v221_v29 }
  0x10   : > { %s168_s19 = scalar_lea.vmem %s1874_s0, %s1549_s10  ;;  %v1632_v52 = vsub.f32 %v1597_v41, %v245_v49  ;;  %1209 = vmatprep.mubr.msk.f32.mxu0 %vm1466_vm0, %v1467_v53  ;;  %1104 = vmatprep.mubr.msk.f32.mxu1 %vm1466_vm0, %v1467_v53  ;;  %v1647_v57 = vsub.f32 %v1607_v44, %v248_v51  ;;  %v310_v61 = vand.u32 4294901760, %v1536_v19  ;;  %v317_v62 = vand.u32 4294901760, %v1553_v24  ;;  %s172_s28 = scalar_lea.vmem %s1876_s2, %s1549_s10 }
  0x11   : > { %v1575_v32 = vld [vmem:[%s168_s19] sm:$0xff]  ;;  %v1651_v58 = vpack.c.bf16 %v303_v55, %v296_v54  ;;  %v297_v59 = vsub.f32 %v1532_v17, %v296_v54  ;;  %v304_v60 = vsub.f32 %v1534_v18, %v303_v55  ;;  %v1657_v63 = vpack.c.bf16 %v230_v33, %v227_v31  ;;  %s176_s5 = scalar_lea.vmem %s1877_s3, %s1549_s10 }
  0x12   : > { %181 = vperm.xlu0 %1449, %v1575_v32   ;;  %1362 = vmatpush3.bf16.msra.mxu0 %v1611_v45  ;;  %v1661_v2 = vpack.c.bf16 %v317_v62, %v310_v61  ;;  %v311_v3 = vsub.f32 %v1536_v19, %v310_v61  ;;  %v318_v5 = vsub.f32 %v1553_v24, %v317_v62  ;;  %v324_v7 = vand.u32 4294901760, %v1555_v25 }
  0x13   : > { %1290 = vmatpush3.bf16.msra.mxu1 %v1611_v45  ;;  %1363 = vmatprep.subr.bf16.mxu0 %v1465_v4  ;;  %v298_v0 = vand.u32 4294901760, %v297_v59  ;;  %v305_v1 = vand.u32 4294901760, %v304_v60  ;;  %v331_v8 = vand.u32 4294901760, %v1573_v28  ;;  %v1677_v14 = vpack.c.bf16 %v236_v35, %v233_v34 }
  0x14   : > { %1291 = vmatprep.subr.bf16.mxu1 %v1465_v4  ;;  %v312_v9 = vand.u32 4294901760, %v311_v3  ;;  %v319_v10 = vand.u32 4294901760, %v318_v5  ;;  %v325_v12 = vsub.f32 %v1555_v25, %v324_v7  ;;  %v338_v22 = vand.u32 4294901760, %v1587_v37 }
  0x15   : > { %v1667_v6 = vpack.c.bf16 %v305_v1, %v298_v0  ;;  %v1671_v11 = vpack.c.bf16 %v331_v8, %v324_v7  ;;  %v332_v13 = vsub.f32 %v1573_v28, %v331_v8  ;;  %v345_v26 = vand.u32 4294901760, %v1589_v38 }
  0x16   : > { %1365 = vmatpush3.bf16.msra.mxu0 %v1642_v56  ;;  %v1679_v15 = vpack.c.bf16 %v319_v10, %v312_v9  ;;  %v326_v20 = vand.u32 4294901760, %v325_v12  ;;  %v339_v31 = vsub.f32 %v1587_v37, %v338_v22  ;;  %v1695_v34 = vpack.c.bf16 %v242_v47, %v239_v40 }
  0x17   : > { %1293 = vmatpush3.bf16.msra.mxu1 %v1642_v56  ;;  %1366 = vmatprep.subr.bf16.mxu0 %v1465_v4  ;;  %v333_v21 = vand.u32 4294901760, %v332_v13  ;;  %v1687_v30 = vpack.c.bf16 %v345_v26, %v338_v22  ;;  %v346_v33 = vsub.f32 %v1589_v38, %v345_v26  ;;  %v352_v54 = vand.u32 4294901760, %v1591_v39 }
  0x18   : > { %1294 = vmatprep.subr.bf16.mxu1 %v1465_v4  ;;  %v340_v35 = vand.u32 4294901760, %v339_v31  ;;  %v359_v55 = vand.u32 4294901760, %v1599_v42  ;;  %v1713_v40 = vpack.c.bf16 %v248_v51, %v245_v49  ;;  %v366_v0 = vand.u32 4294901760, %v1602_v43 }
  0x19   : > { %v1685_v29 = vpack.c.bf16 %v333_v21, %v326_v20  ;;  %v347_v36 = vand.u32 4294901760, %v346_v33  ;;  %v353_v61 = vsub.f32 %v1591_v39, %v352_v54  ;;  %v373_v1 = vand.u32 4294901760, %v1614_v46 }
  0x1a   : > { %1368 = vmatpush3.bf16.msra.mxu0 %v1657_v63  ;;  %v1703_v60 = vpack.c.bf16 %v359_v55, %v352_v54  ;;  %v360_v27 = vsub.f32 %v1599_v42, %v359_v55  ;;  %v367_v41 = vsub.f32 %v1602_v43, %v366_v0  ;;  %v380_v7 = vand.u32 4294901760, %v1620_v48 }
  0x1b   : > { %1296 = vmatpush3.bf16.msra.mxu1 %v1657_v63  ;;  %1369 = vmatprep.subr.bf16.mxu0 %v1465_v4  ;;  %v1701_v59 = vpack.c.bf16 %v347_v36, %v340_v35  ;;  %v354_v47 = vand.u32 4294901760, %v353_v61  ;;  %v1721_v5 = vpack.c.bf16 %v373_v1, %v366_v0  ;;  %v374_v44 = vsub.f32 %v1614_v46, %v373_v1 }
  0x1c   : > { %1297 = vmatprep.subr.bf16.mxu1 %v1465_v4  ;;  %v361_v62 = vand.u32 4294901760, %v360_v27  ;;  %v368_v49 = vand.u32 4294901760, %v367_v41  ;;  %v387_v8 = vand.u32 4294901760, %v1626_v50  ;;  %v381_v12 = vsub.f32 %v1620_v48, %v380_v7 }
  0x1d   : > { %v375_v51 = vand.u32 4294901760, %v374_v44  ;;  %v394_v22 = vand.u32 4294901760, %v1632_v52  ;;  %v401_v26 = vand.u32 4294901760, %v1647_v57  ;;  %v1331_v27 = vpack.c.bf16 %v1534_v18, %v1532_v17 }
  0x1e   : > { %1371 = vmatpush3.bf16.msra.mxu0 %v1677_v14  ;;  %v1719_v3 = vpack.c.bf16 %v361_v62, %v354_v47  ;;  %v1397_v10 = vpack.c.bf16 %v387_v8, %v380_v7  ;;  %v388_v13 = vsub.f32 %v1626_v50, %v387_v8  ;;  %v382_v20 = vand.u32 4294901760, %v381_v12 }
  0x1f   : > { %1299 = vmatpush3.bf16.msra.mxu1 %v1677_v14  ;;  %1372 = vmatprep.subr.bf16.mxu0 %v1465_v4  ;;  %v1322_v9 = vpack.c.bf16 %v375_v51, %v368_v49  ;;  %v1400_v33 = vpack.c.bf16 %v401_v26, %v394_v22  ;;  %v395_v35 = vsub.f32 %v1632_v52, %v394_v22  ;;  %v1468_v51 = vmov 1  }
  0x20   : > { %1300 = vmatprep.subr.bf16.mxu1 %v1465_v4  ;;  %v389_v21 = vand.u32 4294901760, %v388_v13  ;;  %v402_v36 = vsub.f32 %v1647_v57, %v401_v26  ;;  %v1334_v47 = vpack.c.bf16 %v1553_v24, %v1536_v19  ;;  %v1337_v62 = vpack.c.bf16 %v1573_v28, %v1555_v25  ;;  %1450 = vset.pattern.permute.xlu1 %v1468_v51 }
  0x21   : > { %v396_v54 = vand.u32 4294901760, %v395_v35  ;;  %v1340_v0 = vpack.c.bf16 %v1589_v38, %v1587_v37  ;;  %v1343_v1 = vpack.c.bf16 %v1599_v42, %v1591_v39  ;;  %v1346_v41 = vpack.c.bf16 %v1614_v46, %v1602_v43  ;;  %1451 = vset.pattern.permute.xlu0 %v1468_v51  ;;  %855 = vperm.xlu1 %1450, %v1575_v32  }
  0x22   : > { %1374 = vmatpush3.bf16.msra.mxu0 %v1695_v34  ;;  %v1325_v31 = vpack.c.bf16 %v389_v21, %v382_v20  ;;  %v403_v55 = vand.u32 4294901760, %v402_v36  ;;  %v1349_v44 = vpack.c.bf16 %v1626_v50, %v1620_v48  ;;  %v1352_v49 = vpack.c.bf16 %v1647_v57, %v1632_v52 }
  0x23   : > { %1302 = vmatpush3.bf16.msra.mxu1 %v1695_v34  ;;  %1375 = vmatprep.subr.bf16.mxu0 %v1465_v4  ;;  %v178_v7 = vlaneseq  ;;  %v865_v43 = vstv %s967_s29  ;;  %vm869_vm4 = vcmask 7168  }
  0x24   : > { %1303 = vmatprep.subr.bf16.mxu1 %v1465_v4  ;;  %v1328_v61 = vpack.c.bf16 %v403_v55, %v396_v54 }
  0x25   : > { %v1755_v8 = vand.u32 127, %v178_v7  ;;  %v864_v42 = vshrl.u32 %v178_v7, 7 }
  0x26   : > { %1377 = vmatpush3.bf16.msra.mxu0 %v1713_v40 }
  0x27   : > { %1305 = vmatpush3.bf16.msra.mxu1 %v1713_v40  ;;  %1378 = vmatprep.subr.bf16.mxu0 %v1465_v4  ;;  %v866_v46 = vadd.s32 %v865_v43, %v864_v42 }
  0x28   : > { %1306 = vmatprep.subr.bf16.mxu1 %v1465_v4 }
  0x29   : > { %vm867_vm3 = vcmp.lt.s32.totalorder %v866_v46, 14 }
  0x91   : > { %v1757_v12 = vpop.permute.xlu0 %181 }
  0x92   : > { %vm183_vm1 = vcmp.eq.s32.totalorder %v1755_v8, %v1757_v12 }
  0x93   : > { %v963_v13 = vsel %vm183_vm1, 1.0, %v1467_v53 }
  0x94   : > { %v1765_v20 = vsub.f32 %v963_v13, %v963_v13 }
  0x96   : > { %v285_v21 = vand.u32 4294901760, %v1765_v20 }
  0x98   : > { %1210 = vmatmul.mubr.f32.vlgmr.msra.gmra.mrb[0].mxu0 %v285_v21  ;;  %v286_v32 = vsub.f32 %v1765_v20, %v285_v21 }
  0x99   : > { %1380 = vmatpush3.bf16.msra.mxu0 %v1651_v58  ;;  %1244 = vmatprep.mubr.msk.f32.mxu0 %vm1466_vm0, %v1467_v53  ;;  %v1469_v58 = vmov 1.0  }
  0x9a   : > { %1381 = vmatprep.subr.bf16.mxu0 %v1465_v4  ;;  %v287_v22 = vand.u32 4294901760, %v286_v32 }
  0x9c   : > { %1105 = vmatmul.mubr.f32.vlgmr.msra.gmra.mrb[0].mxu1 %v287_v22 }
  0x9d   : > { %1308 = vmatpush3.bf16.msra.mxu1 %v1667_v6  ;;  %1383 = vmatpush3.bf16.msra.mxu0 %v1661_v2 }
  0x9e   : > { %1309 = vmatprep.subr.bf16.mxu1 %v1465_v4  ;;  %1384 = vmatprep.subr.bf16.mxu0 %v1465_v4 }
  0x9f   : > { %1139 = vmatprep.mubr.msk.f32.mxu1 %vm1466_vm0, %v1467_v53 }
  0xa0   : > { %v856_v19 = vpop.permute.xlu1 %855 }
  0xa1   : > { %1311 = vmatpush3.bf16.msra.mxu1 %v1679_v15  ;;  %1386 = vmatpush3.bf16.msra.mxu0 %v1671_v11  ;;  %vm857_vm2 = vcmp.eq.s32.totalorder %v1755_v8, %v856_v19 }
  0xa2   : > { %1312 = vmatprep.subr.bf16.mxu1 %v1465_v4  ;;  %1387 = vmatprep.subr.bf16.mxu0 %v1465_v4 }
  0xa5   : > { %1314 = vmatpush3.bf16.msra.mxu1 %v1685_v29  ;;  %1389 = vmatpush3.bf16.msra.mxu0 %v1687_v30 }
  0xa6   : > { %1315 = vmatprep.subr.bf16.mxu1 %v1465_v4  ;;  %1390 = vmatprep.subr.bf16.mxu0 %v1465_v4 }
  0xa9   : > { %1317 = vmatpush3.bf16.msra.mxu1 %v1701_v59  ;;  %1392 = vmatpush3.bf16.msra.mxu0 %v1703_v60 }
  0xaa   : > { %1318 = vmatprep.subr.bf16.mxu1 %v1465_v4  ;;  %1393 = vmatprep.subr.bf16.mxu0 %v1465_v4 }
  0xad   : > { %1320 = vmatpush3.bf16.msra.mxu1 %v1719_v3  ;;  %1395 = vmatpush3.bf16.msra.mxu0 %v1721_v5 }
  0xae   : > { %1321 = vmatprep.subr.bf16.mxu1 %v1465_v4  ;;  %1396 = vmatprep.subr.bf16.mxu0 %v1465_v4 }
  0xb1   : > { %1323 = vmatpush3.bf16.msra.mxu1 %v1322_v9  ;;  %1398 = vmatpush3.bf16.msra.mxu0 %v1397_v10 }
  0xb2   : > { %1324 = vmatprep.subr.bf16.mxu1 %v1465_v4  ;;  %1399 = vmatprep.subr.bf16.mxu0 %v1465_v4 }
  0xb5   : > { %1326 = vmatpush3.bf16.msra.mxu1 %v1325_v31  ;;  %1401 = vmatpush3.bf16.msra.mxu0 %v1400_v33 }
  0xb6   : > { %1327 = vmatprep.subr.bf16.mxu1 %v1465_v4  ;;  %1402 = vmatprep.subr.bf16.mxu0 %v1465_v4 }
  0xb8   : > { %1245 = vmatmul.mubr.msk.f32.vlgmr.msra.gmra.mrb[0].mxu0 %vm183_vm1, %v1469_v58 }
  0xb9   : > { %1329 = vmatpush3.bf16.msra.mxu1 %v1328_v61  ;;  %1404 = vmatpush3.bf16.msra.mxu0 %v1530_v16 }
  0xba   : > { %1330 = vmatprep.subr.bf16.mxu1 %v1465_v4  ;;  %1405 = vmatprep.subr.bf16.mxu0 %v1465_v4 }
  0xbb   : > { %1279 = vmatprep.mubr.msk.f32.mxu0 %vm1466_vm0, %v1467_v53 }
  0xbc   : > { %1140 = vmatmul.mubr.msk.f32.vlgmr.msra.gmra.mrb[0].mxu1 %vm183_vm1, %v1469_v58 }
  0xbd   : > { %1332 = vmatpush3.bf16.msra.mxu1 %v1331_v27  ;;  %1407 = vmatpush3.bf16.msra.mxu0 %v1551_v23 }
  0xbe   : > { %1333 = vmatprep.subr.bf16.mxu1 %v1465_v4  ;;  %1408 = vmatprep.subr.bf16.mxu0 %v1465_v4 }
  0xbf   : > { %1174 = vmatprep.mubr.msk.f32.mxu1 %vm1466_vm0, %v1467_v53 }
  0xc1   : > { %1335 = vmatpush3.bf16.msra.mxu1 %v1334_v47  ;;  %1410 = vmatpush3.bf16.msra.mxu0 %v1611_v45 }
  0xc2   : > { %1336 = vmatprep.subr.bf16.mxu1 %v1465_v4  ;;  %1411 = vmatprep.subr.bf16.mxu0 %v1465_v4 }
  0xc5   : > { %1338 = vmatpush3.bf16.msra.mxu1 %v1337_v62  ;;  %1413 = vmatpush3.bf16.msra.mxu0 %v1642_v56 }
  0xc6   : > { %1339 = vmatprep.subr.bf16.mxu1 %v1465_v4  ;;  %1414 = vmatprep.subr.bf16.mxu0 %v1465_v4 }
  0xc9   : > { %1341 = vmatpush3.bf16.msra.mxu1 %v1340_v0  ;;  %1416 = vmatpush3.bf16.msra.mxu0 %v1657_v63 }
  0xca   : > { %1342 = vmatprep.subr.bf16.mxu1 %v1465_v4  ;;  %1417 = vmatprep.subr.bf16.mxu0 %v1465_v4 }
  0xcd   : > { %1344 = vmatpush3.bf16.msra.mxu1 %v1343_v1  ;;  %1419 = vmatpush3.bf16.msra.mxu0 %v1677_v14 }
  0xce   : > { %1345 = vmatprep.subr.bf16.mxu1 %v1465_v4  ;;  %1420 = vmatprep.subr.bf16.mxu0 %v1465_v4 }
  0xd1   : > { %1347 = vmatpush3.bf16.msra.mxu1 %v1346_v41  ;;  %1422 = vmatpush3.bf16.msra.mxu0 %v1695_v34 }
  0xd2   : > { %1348 = vmatprep.subr.bf16.mxu1 %v1465_v4  ;;  %1423 = vmatprep.subr.bf16.mxu0 %v1465_v4 }
  0xd5   : > { %1350 = vmatpush3.bf16.msra.mxu1 %v1349_v44  ;;  %1425 = vmatpush3.bf16.msra.mxu0 %v1713_v40 }
  0xd6   : > { %1351 = vmatprep.subr.bf16.mxu1 %v1465_v4 }
  0xd8   : > { %1280 = vmatmul.mubr.msk.f32.vlgmr.msra.gmra.mrb[0].mxu0 %vm183_vm1, %v1469_v58 }
  0xd9   : > { %1353 = vmatpush3.bf16.msra.mxu1 %v1352_v49 }
  0xdc   : > { %1175 = vmatmul.mubr.f32.vlgmr.msra.gmra.mrb[0].mxu1 %v1765_v20 }
 0x1ab   : > { %v839_v16 = vpop.f32.mrb[0].mxu0 }
 0x1ac   : > { %v1281_v17 = vpop.f32.mrb[1].mxu0 }
 0x1af   : > { %v544_v18 = vpop.f32.mrb[0].mxu1 }
 0x1b0   : > { %v1426_v4 = vadd.f32 %v839_v16, %v544_v18  ;;  %v1176_v23 = vpop.f32.mrb[1].mxu1 }
 0x1b2   : > { %843 = vst [vmem:[%s172_s28] sm:$0xff] %v1426_v4  ;;  %844 = vmax.xlane.f32.xlu0 %v1426_v4  ;;  %v858_v24 = vsel %vm857_vm2, %v1426_v4, 0.0 }
 0x1b6   : > { %859 = vadd.xlane.f32.xlu0 %v858_v24 }
 0x23f   : > { %v845_v25 = vpop.xlane.xlu0 %844 }
 0x240   : > { %v846_v28 = vsub.f32 %v1426_v4, %v845_v25 }
 0x242   : > { %v847_v37 = vmul.f32 1.442695, %v846_v28 }
 0x243   : > { %v860_v52 = vpop.xlane.xlu0 %859 }
 0x244   : > { %1452 = vpow2.f32 %v847_v37 }
 0x24e   : > { %v1453_v38 = vpop.eup %1452 }
 0x24f   : > { %849 = vadd.xlane.f32.xlu1 %v1453_v38 }
 0x2dc   : > { %v850_v39 = vpop.xlane.xlu1 %849 }
 0x2dd   : > { %1454 = vlog2.f32 %v850_v39 }
 0x2e7   : > { %v1455_v45 = vpop.eup %1454 }
 0x2e8   : > { %v852_v48 = vmul.f32 0.6931472, %v1455_v45 }
 0x2ea   : > { %v853_v50 = vadd.f32 %v852_v48, %v845_v25 }
 0x2ec   : > { %v861_v53 = vsub.f32 %v853_v50, %v860_v52 }
 0x2ee   : > { %v868_v56 = vsel %vm867_vm3, %v861_v53, 0.0 }
 0x2ef   : > { %870 = vst.msk [vmem:[%s176_s5] sm:$0xff] %vm869_vm4, %v868_v56 }
 0x2f0 PF: > { %s14_s12 = sadd.s32 1, %s1462_s12  }
 0x2f1   : > { %p11_p4 = scmp.ge.s32.totalorder %s14_s12, 4  }
 0x2f3   :  { %13 = sbr.rel (!%p11_p4) target bundleno = 1 (0x1), region = 70 }

</bundles_post_ra>
